<compile_context>
chip_gen: v5e
topology: v5e:2x2
jax: 0.10.0
libtpu: 0.0.40
codegen_flags: <defaults>
</compile_context>

<pallas_src>
import functools

import jax
import jax.numpy as jnp
from jax.experimental import pallas as pl
from jax.experimental.pallas import tpu as pltpu


def _h_sigmoid_kernel(x_ref, o_ref):
    # relu6(x + 3) / 6 == clamp(x + 3, 0, 6) * (1/6); compute in f32, cast on store.
    x = x_ref[...].astype(jnp.float32)
    o_ref[...] = (jnp.clip(x + 3.0, 0.0, 6.0) * (1.0 / 6.0)).astype(o_ref.dtype)


def h_sigmoid_ref(x):
    """Pure-JAX reference (and fallback path): relu6(x + 3) / 6."""
    xf = x.astype(jnp.float32)
    return (jnp.clip(xf + 3.0, 0.0, 6.0) * (1.0 / 6.0)).astype(x.dtype)


_LANE_CANDIDATES = (1024, 512, 256, 128)
_MIN_PALLAS_ELEMS = 1 << 16  # below this, a Pallas launch can't beat XLA's fused elementwise


def _pick_lane(n):
    # Prefer the widest lane count that still leaves >= 8 rows (full sublane tiles),
    # otherwise the widest divisor at all. None -> element count not 128-divisible.
    for cand in _LANE_CANDIDATES:
        if n % cand == 0 and (n // cand) >= 8:
            return cand
    for cand in _LANE_CANDIDATES:
        if n % cand == 0:
            return cand
    return None


@functools.lru_cache(maxsize=1)
def _device_tuning():
    """Return (per-block VMEM byte budget, TensorCores sharing the grid)."""
    try:
        kind = jax.devices()[0].device_kind.lower()
    except Exception:  # pragma: no cover - defensive
        kind = ""
    if "v5 lite" in kind or "v5lite" in kind or "v5e" in kind:
        return 2 * 1024 * 1024, 1   # 16 MiB scoped-VMEM default: keep blocks small
    if "v6" in kind:
        return 4 * 1024 * 1024, 1   # single TC, 32 MiB scoped VMEM: 4 MiB blocks
    if "v7" in kind or "7x" in kind:
        return 4 * 1024 * 1024, 2   # dual TC, 64 MiB physical VMEM: cap at 4 MiB
    if "v4" in kind:
        return 2 * 1024 * 1024, 2   # megacore (2 TCs behind one device)
    return 2 * 1024 * 1024, 1       # unknown / older parts: conservative


def h_sigmoid(x: jax.Array, *, force_pallas: bool = False,
              block_bytes: int | None = None, donate: bool = False) -> jax.Array:
    """Elementwise hard-sigmoid: relu6(x + 3) / 6. Accepts any shape, float dtypes."""
    if not jnp.issubdtype(x.dtype, jnp.floating):
        # PyTorch's hardsigmoid rejects integer tensors as well.
        raise TypeError(f"h_sigmoid supports floating dtypes only, got {x.dtype}")
    n = int(x.size)
    if n == 0:
        return x  # guard: never launch an empty grid

    lane = _pick_lane(n)
    # Fall back to plain XLA (one fused read+write HBM pass) when the Pallas kernel
    # cannot win: element count not divisible by 128 (the old pad+slice path cost
    # two extra HBM passes) or tiny tensors where launch/DMA prologue dominates.
    # TODO(synk): handle a <128-element tail in-kernel (masked store) instead of
    # falling back for non-multiple-of-128 sizes.
    if lane is None or (n < _MIN_PALLAS_ELEMS and not force_pallas):
        return h_sigmoid_ref(x)

    orig_shape = x.shape
    dtype = x.dtype
    itemsize = jnp.dtype(dtype).itemsize

    rows = n // lane
    x2 = x.reshape(rows, lane)            # lane-dense slab; free for contiguous input

    sub = max(8, 32 // max(itemsize, 1))  # sublane multiple: 8 f32, 16 bf16, 32 int8/fp8

    budget, cores = _device_tuning()
    if block_bytes is not None:
        budget = int(block_bytes)

    # Block rows from the per-device VMEM budget, rounded to a sublane multiple.
    tile_rows = max(sub, (budget // (lane * itemsize) // sub) * sub)
    tile_rows = min(tile_rows, rows)      # tiny inputs: block == full extent (allowed)

    # Dual-TC parts only: aim for an even number of grid steps (>= 2 per core) so
    # both TensorCores get balanced, pipelined work. Single-TC parts keep the
    # biggest block that fits the budget (splitting is pure per-step overhead).
    if cores > 1 and rows > tile_rows:
        steps = pl.cdiv(rows, tile_rows)
        steps = max(2 * cores, steps + (steps % 2))
        even_tile = ((-(-rows // steps) + sub - 1) // sub) * sub
        tile_rows = max(sub, min(tile_rows, even_tile, rows))

    grid_rows = pl.cdiv(rows, tile_rows)  # partial last block handled by Pallas masking

    out2 = pl.pallas_call(
        _h_sigmoid_kernel,
        out_shape=jax.ShapeDtypeStruct((rows, lane), dtype),
        grid=(grid_rows,),
        in_specs=[pl.BlockSpec((tile_rows, lane), lambda i: (i, 0))],
        out_specs=pl.BlockSpec((tile_rows, lane), lambda i: (i, 0)),
        compiler_params=pltpu.CompilerParams(
            dimension_semantics=("parallel",),
        ),
        cost_estimate=pl.CostEstimate(
            flops=4 * n, transcendentals=0, bytes_accessed=2 * n * itemsize),
        # donate=True mirrors PyTorch's inplace=True: reuse x's HBM buffer for the
        # output (only truly in-place when the caller donates x under jit).
        input_output_aliases=({0: 0} if donate else {}),
    )(x2)

    return out2.reshape(orig_shape)


if __name__ == "__main__":
    key = jax.random.PRNGKey(0)

    # 1) Small NCHW input matching the module's typical use (batch=2, ch=4, 16x16).
    #    Forced through the Pallas path so the kernel itself is exercised.
    x1 = jax.random.normal(key, (2, 4, 16, 16), dtype=jnp.float32) * 4.0
    y1 = jax.block_until_ready(h_sigmoid(x1, force_pallas=True))
    assert y1.shape == x1.shape and y1.dtype == x1.dtype
    assert jnp.allclose(y1, h_sigmoid_ref(x1), atol=1e-6, rtol=1e-5), "mismatch (case 1)"

    # 2) Larger activation: auto-dispatch takes the Pallas path. A small explicit
    #    block budget forces a multi-step grid with a masked partial last block;
    #    the second run uses the device-tuned default blocks.
    x2 = jax.random.normal(jax.random.PRNGKey(1), (4, 32, 40, 40), dtype=jnp.float32) * 4.0
    y2 = jax.block_until_ready(h_sigmoid(x2, block_bytes=64 * 1024))
    assert jnp.allclose(y2, h_sigmoid_ref(x2), atol=1e-6, rtol=1e-5), "mismatch (case 2a)"
    y2b = jax.block_until_ready(h_sigmoid(x2))
    assert jnp.allclose(y2b, h_sigmoid_ref(x2), atol=1e-6, rtol=1e-5), "mismatch (case 2b)"

    # 3) bf16 input: kernel computes in f32 and casts back on store.
    x3 = (jax.random.normal(jax.random.PRNGKey(2), (3, 8, 24, 24), dtype=jnp.float32) * 4.0
          ).astype(jnp.bfloat16)
    y3 = jax.block_until_ready(h_sigmoid(x3, force_pallas=True))
    assert y3.shape == x3.shape and y3.dtype == jnp.bfloat16
    assert jnp.allclose(y3.astype(jnp.float32), h_sigmoid_ref(x3).astype(jnp.float32),
                        atol=1e-2, rtol=1e-2), "mismatch (case 3)"

    # 4) Element count not divisible by 128 -> single-pass XLA fallback (no pad/slice).
    x4 = jax.random.normal(jax.random.PRNGKey(3), (3, 5, 7, 7), dtype=jnp.float32) * 4.0
    y4 = jax.block_until_ready(h_sigmoid(x4))
    assert y4.shape == x4.shape
    assert jnp.allclose(y4, h_sigmoid_ref(x4), atol=1e-6, rtol=1e-5), "mismatch (case 4)"

    print("KERNEL_OK")
</pallas_src>

<mosaic_0001>
module attributes {stable_mosaic.version = 11 : i64} {
  func.func @_h_sigmoid_kernel(%arg0: i32, %arg1: memref<8x256xf32, #tpu.memory_space<vmem>>, %arg2: memref<8x256xf32, #tpu.memory_space<vmem>>) attributes {dimension_semantics = [#tpu.dimension_semantics<parallel>], iteration_bounds = array<i64: 1>, scalar_prefetch = 0 : i64, scratch_operands = 0 : i64, tpu.core_type = #tpu.core_type<tc>, window_params = [{transform_indices = @transform_0, window_bounds = array<i64: 8, 256>}, {transform_indices = @transform_1, window_bounds = array<i64: 8, 256>}]} {
    %c0 = arith.constant 0 : index
    %c0_0 = arith.constant 0 : index
    %0 = vector.load %arg1[%c0, %c0_0] : memref<8x256xf32, #tpu.memory_space<vmem>>, vector<8x256xf32>
    %cst = arith.constant 3.000000e+00 : f32
    %1 = vector.broadcast %cst : f32 to vector<8x256xf32>
    %2 = arith.addf %0, %1 : vector<8x256xf32>
    %cst_1 = arith.constant 0.000000e+00 : f32
    %cst_2 = arith.constant 6.000000e+00 : f32
    %3 = vector.broadcast %cst_1 : f32 to vector<8x256xf32>
    %4 = arith.maximumf %3, %2 : vector<8x256xf32>
    %5 = vector.broadcast %cst_2 : f32 to vector<8x256xf32>
    %6 = arith.minimumf %5, %4 : vector<8x256xf32>
    %cst_3 = arith.constant 0.166666672 : f32
    %7 = vector.broadcast %cst_3 : f32 to vector<8x256xf32>
    %8 = arith.mulf %6, %7 : vector<8x256xf32>
    %c0_4 = arith.constant 0 : index
    %c0_5 = arith.constant 0 : index
    %9 = vector.load %arg2[%c0_4, %c0_5] : memref<8x256xf32, #tpu.memory_space<vmem>>, vector<8x256xf32>
    tpu.vector_store %arg2[%c0_4, %c0_5], %8 {strides = array<i32>} : memref<8x256xf32, #tpu.memory_space<vmem>>, vector<8x256xf32>,
    return
  }
  func.func @transform_0(%arg0: i32) -> (i32, i32) {
    %c0_i32 = arith.constant 0 : i32
    %c0_i32_0 = arith.constant 0 : i32
    return %arg0, %c0_i32 : i32, i32
  }
  func.func @transform_1(%arg0: i32) -> (i32, i32) {
    %c0_i32 = arith.constant 0 : i32
    %c0_i32_0 = arith.constant 0 : i32
    return %arg0, %c0_i32 : i32, i32
  }
}

</mosaic_0001>

<bundles_post_ra>
// kernel: tpu_custom_call.1
= control target key start
LH: loop header
LB: loop body
LE: loop exit
PB: predicated region body
PF: predicated region fallthrough
CT: control target
= control target key end

     0   :  { %6 = vsyncpa [#allocation3], 0  ;;  %s124_s0 = inlined_call_operand.hbm [shape: f32[8,256], index: 0, kind: input, shape index: {}]   ;;  %s125_s1 = inlined_call_operand.hbm [shape: f32[8,256], index: 1, kind: output, shape index: {}]  }
   0x1   :  { %7 = vsyncpa [#allocation4], 0  ;;  %s13_s8 = sshll.u32 %s124_s0, 4  ;;  %s106_s9 = smov [#allocation2]   ;;  %s14_s8 = int_to_ptr.hbm [resolvable:$true] %s13_s8 }
   0x2   :  { %s15_s10 = sshll.u32 %s106_s9, 4  ;;  %s16_s10 = int_to_ptr.vmem [resolvable:$true] %s15_s10 }
   0x3   :  { %18 = dma.hbm_to_vmem [thread:$0]  %s14_s8, 256, %s16_s10, [#allocation3]  }
   0x4   :  { %102 = dma.done.wait [#allocation3], 256  }
   0x5   :  { %103 = vsyncadd [#allocation3], 4294967040  ;;  %v23_v0 = vld [vmem:[#allocation2] sm:$0xff]  ;;  %v24_v1 = vld [vmem:[#allocation2 + $0x8] sm:$0xff]  ;;  %s107_s11 = smov [#allocation5]   ;;  %s42_s0 = sshll.u32 %s125_s1, 4  ;;  %s43_s0 = int_to_ptr.hbm [resolvable:$true] %s42_s0 }
   0x6   :  { %v25_v2 = vadd.f32 3.0, %v23_v0  ;;  %v26_v3 = vadd.f32 3.0, %v24_v1  ;;  %s40_s12 = sshll.u32 %s107_s11, 4  ;;  %s41_s12 = int_to_ptr.vmem [resolvable:$true] %s40_s12 }
   0x8   :  { %v27_v4 = vmax.f32 %v25_v2, 0.0  ;;  %v28_v5 = vmax.f32 %v26_v3, 0.0 }
   0xa   :  { %v29_v6 = vmin.f32 %v27_v4, 6.0  ;;  %v30_v7 = vmin.f32 %v28_v5, 6.0 }
   0xc   :  { %v31_v8 = vmul.f32 0.16666667, %v29_v6  ;;  %v32_v9 = vmul.f32 0.16666667, %v30_v7 }
   0xe   :  { %33 = vst [vmem:[#allocation5] sm:$0xff] %v31_v8 }
   0xf   :  { %34 = vst [vmem:[#allocation5 + $0x8] sm:$0xff] %v32_v9 }
  0x10   :  { %45 = dma.vmem_to_hbm [thread:$0]  %s41_s12, 256, %s43_s0, [#allocation4]  }
  0x11   :  { %104 = dma.done.wait [#allocation4], 256  }
  0x12   :  { %105 = vsyncadd [#allocation4], 4294967040 }
  0x13   :  { %50 = vsyncpa [#allocation3], 1 }
  0x14   :  { %51 = vsyncpa [#allocation4], 1 }

</bundles_post_ra>
